<compile_context>
chip_gen: v6e
topology: v6e:2x2x1
jax: 0.10.0
libtpu: 0.0.40
codegen_flags: <defaults>
</compile_context>

<pallas_src>
import jax
import jax.numpy as jnp
from jax import lax
from jax.experimental import pallas as pl
from jax.experimental.pallas import tpu as pltpu

EPS = 1e-6
GAMMA = 0.1
BIG = 3.4e38       # sentinel for "no same-label prototype" min-distance
PAD_D2 = 1e30      # folded-aux value for padded prototype columns:
                   # sqrt -> 1e15, exp(-gamma*1e15) underflows cleanly to 0.


def _round_up(x, m):
    return ((x + m - 1) // m) * m


def _chip_info():
    """(num_tensorcores, mxu_dim, physical_vmem_bytes) with safe fallbacks."""
    try:
        kind = jax.devices()[0].device_kind.lower()
    except Exception:
        kind = ""
    is_v7 = ("v7" in kind) or ("7x" in kind)
    is_v6 = "v6" in kind
    num_tc = 2 if is_v7 else 1
    mxu = 256 if (is_v7 or is_v6) else 128
    vmem = (64 << 20) if is_v7 else (128 << 20)
    return num_tc, mxu, vmem


def _make_kernel(tb, gamma):
    gamma = float(gamma)

    def kernel(f_ref,      # (tb, Dp)  f32  features (zero padded)
               pTm2_ref,   # (Dp, tn)  f32  -2 * prototype_bank^T (zero padded)
               paux_ref,   # (8,  tn)  f32  row0 = ||p||^2 - 2*eps*sum(p) + D*eps^2
                           #                       (PAD_D2 on padded columns)
                           #                row1 = prototype label as f32 (-1e9 pad)
               lab_ref,    # (tb, 128) f32  per-sample label, lane-broadcast
               out_ref,    # (tb, 128) f32  lane0=loss, lane1=prob, lane2=min_d
               one_sc,     # (tb, 1)   f32  acc: sum exp(-gamma d) over all protos
               num_sc,     # (tb, 1)   f32  acc: same-label numerator
               min_sc):    # (tb, 1)   f32  acc: min same-label distance
        k = pl.program_id(1)

        @pl.when(k == 0)
        def _():
            one_sc[...] = jnp.zeros_like(one_sc)
            num_sc[...] = jnp.zeros_like(num_sc)
            min_sc[...] = jnp.full_like(min_sc, BIG)

        f = f_ref[...]
        pconst = paux_ref[0:1, :]                       # (1, tn)
        plab = paux_ref[1:2, :]                         # (1, tn)
        lab = lab_ref[:, 0:1]                           # (tb, 1)

        # ||f - p + eps||^2 = (-2 f.p) + (||f||^2 + 2 eps sum f)
        #                     + (||p||^2 - 2 eps sum p + D eps^2)
        frow = jnp.sum(f * f + (2.0 * EPS) * f, axis=-1, keepdims=True)
        cross = jnp.dot(f, pTm2_ref[...],
                        preferred_element_type=jnp.float32)          # MXU
        d2 = jnp.maximum(cross + frow + pconst, 0.0)
        dist = jnp.sqrt(d2)

        w = jnp.exp(-gamma * dist)                      # padded cols -> 0
        same = (lab == plab).astype(jnp.float32)        # (tb, tn) VPU compare

        one_sc[...] += jnp.sum(w, axis=-1, keepdims=True)
        num_sc[...] += jnp.sum(w * same, axis=-1, keepdims=True)
        min_sc[...] = jnp.minimum(
            min_sc[...],
            jnp.min(jnp.where(same > 0.0, dist, BIG), axis=-1, keepdims=True))

        @pl.when(k == pl.num_programs(1) - 1)
        def _():
            one = one_sc[...]
            num = num_sc[...]
            prob = jnp.where(one > 0.0, num / jnp.maximum(one, 1e-30),
                             num + 1e-6)
            loss = -jnp.log(prob)
            lane = lax.broadcasted_iota(jnp.int32, (tb, 128), 1)
            out_ref[...] = jnp.where(lane == 0, loss,
                           jnp.where(lane == 1, prob,
                           jnp.where(lane == 2, min_sc[...], 0.0)))

    return kernel


def dce_loss(features, prototypes, proto_labels, labels, gamma=GAMMA):
    """features: (B, D) f32; prototypes: (N, D) f32; proto_labels: (N,) i32;
    labels: (B,) i32.  Returns (loss, prob, min_distance), each (B,) f32."""
    features = jnp.asarray(features, jnp.float32)
    prototypes = jnp.asarray(prototypes, jnp.float32)
    proto_labels = jnp.asarray(proto_labels, jnp.int32).reshape(-1)
    labels = jnp.asarray(labels, jnp.int32).reshape(-1)

    B, D = features.shape
    N = prototypes.shape[0]

    num_tc, mxu, vmem_phys = _chip_info()
    lane_align = mxu                      # 256 on v6e/v7x, 128 on v5e

    # --- batch tiling: ensure >= num_tc tiles so "parallel" uses both TCs.
    tb_max = 256 if mxu == 256 else 128
    tb = min(tb_max, _round_up(max(1, -(-B // num_tc)), 8))
    tb = max(tb, 8)
    b_pad = _round_up(B, tb)
    if b_pad // tb < num_tc:
        b_pad = tb * num_tc

    # --- contraction / prototype axes (N tiled so huge banks stream via HBM).
    d_pad = _round_up(D, lane_align)
    PT_BUDGET = 12 << 20                  # VMEM budget for prototype-tile bufs
    col_bytes = d_pad * 4
    n_pad_min = _round_up(N, lane_align)
    if n_pad_min * col_bytes <= PT_BUDGET:
        tn = n_pad_min                    # whole bank resident, single-buffered
    else:                                 # stream the bank, double-buffered
        tn = max(lane_align,
                 (PT_BUDGET // (2 * col_bytes)) // lane_align * lane_align)
    n_pad = _round_up(N, tn)
    n_tiles = n_pad // tn
    resident_bank = (n_tiles == 1)

    # --- host-side packing (folded constants).
    f_pad = jnp.zeros((b_pad, d_pad), jnp.float32).at[:B, :D].set(features)
    pTm2 = jnp.zeros((d_pad, n_pad), jnp.float32).at[:D, :N].set(
        -2.0 * prototypes.T)

    pconst = (jnp.sum(prototypes * prototypes, axis=-1)
              - 2.0 * EPS * jnp.sum(prototypes, axis=-1)
              + float(D) * EPS * EPS)
    paux = jnp.zeros((8, n_pad), jnp.float32)
    paux = paux.at[0, :].set(PAD_D2).at[0, :N].set(pconst)
    paux = paux.at[1, :].set(-1e9).at[1, :N].set(
        proto_labels.astype(jnp.float32))

    lab_slab = jnp.full((b_pad, 128), -1.0, jnp.float32)
    lab_slab = lab_slab.at[:B, :].set(
        jnp.broadcast_to(labels.astype(jnp.float32)[:, None], (B, 128)))

    # --- specs.
    bank_mode = dict(pipeline_mode=pl.Buffered(1)) if resident_bank else {}
    in_specs = [
        pl.BlockSpec((tb, d_pad), lambda i, k: (i, 0)),               # features
        pl.BlockSpec((d_pad, tn), lambda i, k: (0, k), **bank_mode),  # -2 p^T
        pl.BlockSpec((8, tn), lambda i, k: (0, k), **bank_mode),      # aux rows
        pl.BlockSpec((tb, 128), lambda i, k: (i, 0)),                 # labels
    ]
    out_spec = pl.BlockSpec((tb, 128), lambda i, k: (i, 0))

    # --- explicit scoped-VMEM limit sized from the actual tiles.
    pt_bufs = 1 if resident_bank else 2
    vmem_bytes = (pt_bufs * (d_pad * tn + 8 * tn) * 4
                  + 2 * tb * d_pad * 4        # features (double-buffered)
                  + 2 * tb * 128 * 4          # labels slab
                  + 2 * tb * 128 * 4          # output slab
                  + 3 * tb * 4)               # accumulators
    vmem_limit = int(min(max(vmem_bytes + (4 << 20), 32 << 20),
                         int(0.85 * vmem_phys)))

    bank_passes = 1 if resident_bank else (b_pad // tb)
    cost = pl.CostEstimate(
        flops=2 * b_pad * d_pad * n_pad,
        transcendentals=3 * b_pad * n_pad,
        bytes_accessed=(b_pad * d_pad * 4
                        + bank_passes * (d_pad + 8) * n_pad * 4
                        + 2 * b_pad * 128 * 4))

    kernel = _make_kernel(tb, gamma)
    out = pl.pallas_call(
        kernel,
        out_shape=jax.ShapeDtypeStruct((b_pad, 128), jnp.float32),
        grid_spec=pltpu.PrefetchScalarGridSpec(
            num_scalar_prefetch=0,
            grid=(b_pad // tb, n_tiles),
            in_specs=in_specs,
            out_specs=out_spec,
            scratch_shapes=[pltpu.VMEM((tb, 1), jnp.float32)] * 3,
        ),
        compiler_params=pltpu.CompilerParams(
            dimension_semantics=("parallel", "arbitrary"),
            vmem_limit_bytes=vmem_limit),
        cost_estimate=cost,
    )(f_pad, pTm2, paux, lab_slab)

    return out[:B, 0], out[:B, 1], out[:B, 2]


def _reference(features, prototypes, proto_labels, labels, gamma=GAMMA):
    diff = features[:, None, :] - prototypes[None, :, :] + EPS   # (B, N, D)
    dist = jnp.sqrt(jnp.sum(diff * diff, axis=-1))               # (B, N)
    w = jnp.exp(-gamma * dist)
    one = jnp.sum(w, axis=-1)
    same = (labels[:, None] == proto_labels[None, :])
    num = jnp.sum(w * same.astype(jnp.float32), axis=-1)
    prob = jnp.where(one > 0.0, num / one, num + 1e-6)
    min_d = jnp.min(jnp.where(same, dist, BIG), axis=-1)
    return -jnp.log(prob), prob, min_d


if __name__ == "__main__":
    key = jax.random.PRNGKey(0)
    k1, k2 = jax.random.split(key)

    B = 8          # batch of query features
    D = 32         # feature dim
    N = 8          # stored prototypes
    n_classes = 4

    features = jax.random.normal(k1, (B, D), dtype=jnp.float32)
    prototypes = jax.random.normal(k2, (N, D), dtype=jnp.float32)
    proto_labels = jnp.arange(N, dtype=jnp.int32) % n_classes    # [0,1,2,3,0,1,2,3]
    labels = jnp.arange(B, dtype=jnp.int32) % n_classes

    loss, prob, min_d = dce_loss(features, prototypes, proto_labels, labels)
    jax.block_until_ready((loss, prob, min_d))

    ref_loss, ref_prob, ref_min = _reference(features, prototypes, proto_labels, labels)
    assert jnp.allclose(loss, ref_loss, rtol=1e-4, atol=1e-5), (loss, ref_loss)
    assert jnp.allclose(prob, ref_prob, rtol=1e-4, atol=1e-5), (prob, ref_prob)
    assert jnp.allclose(min_d, ref_min, rtol=1e-4, atol=1e-5), (min_d, ref_min)

    print("KERNEL_OK")
</pallas_src>

<mosaic_0001>
module attributes {stable_mosaic.version = 11 : i64} {
  func.func @kernel(%arg0: i32, %arg1: i32, %arg2: memref<8x128xf32, #tpu.memory_space<vmem>>, %arg3: memref<128x128xf32, #tpu.memory_space<vmem>>, %arg4: memref<8x128xf32, #tpu.memory_space<vmem>>, %arg5: memref<8x128xf32, #tpu.memory_space<vmem>>, %arg6: memref<8x128xf32, #tpu.memory_space<vmem>>, %arg7: memref<8x1xf32, #tpu.memory_space<vmem>>, %arg8: memref<8x1xf32, #tpu.memory_space<vmem>>, %arg9: memref<8x1xf32, #tpu.memory_space<vmem>>) attributes {dimension_semantics = [#tpu.dimension_semantics<parallel>, #tpu.dimension_semantics<arbitrary>], iteration_bounds = array<i64: 1, 1>, scalar_prefetch = 0 : i64, scratch_operands = 3 : i64, tpu.core_type = #tpu.core_type<tc>, window_params = [{transform_indices = @transform_0, window_bounds = array<i64: 8, 128>}, {pipeline_mode = #tpu.pipeline_mode<synchronous>, transform_indices = @transform_1, window_bounds = array<i64: 128, 128>}, {pipeline_mode = #tpu.pipeline_mode<synchronous>, transform_indices = @transform_2, window_bounds = array<i64: 8, 128>}, {transform_indices = @transform_3, window_bounds = array<i64: 8, 128>}, {transform_indices = @transform_4, window_bounds = array<i64: 8, 128>}]} {
    %c0_i32 = arith.constant 0 : i32
    %0 = arith.cmpi eq, %arg1, %c0_i32 : i32
    %1 = arith.extui %0 : i1 to i32
    %c0_i32_0 = arith.constant 0 : i32
    %2 = arith.cmpi ne, %1, %c0_i32_0 : i32
    scf.if %2 {
      %cst_32 = arith.constant 0.000000e+00 : f32
      %53 = vector.broadcast %cst_32 : f32 to vector<8x1xf32>
      %c0_33 = arith.constant 0 : index
      %c0_34 = arith.constant 0 : index
      %54 = vector.load %arg7[%c0_33, %c0_34] : memref<8x1xf32, #tpu.memory_space<vmem>>, vector<8x1xf32>
      tpu.vector_store %arg7[%c0_33, %c0_34], %53 {strides = array<i32>} : memref<8x1xf32, #tpu.memory_space<vmem>>, vector<8x1xf32>,
      %cst_35 = arith.constant 0.000000e+00 : f32
      %55 = vector.broadcast %cst_35 : f32 to vector<8x1xf32>
      %c0_36 = arith.constant 0 : index
      %c0_37 = arith.constant 0 : index
      %56 = vector.load %arg8[%c0_36, %c0_37] : memref<8x1xf32, #tpu.memory_space<vmem>>, vector<8x1xf32>
      tpu.vector_store %arg8[%c0_36, %c0_37], %55 {strides = array<i32>} : memref<8x1xf32, #tpu.memory_space<vmem>>, vector<8x1xf32>,
      %cst_38 = arith.constant 3.400000e+38 : f32
      %57 = vector.broadcast %cst_38 : f32 to vector<8x1xf32>
      %c0_39 = arith.constant 0 : index
      %c0_40 = arith.constant 0 : index
      %58 = vector.load %arg9[%c0_39, %c0_40] : memref<8x1xf32, #tpu.memory_space<vmem>>, vector<8x1xf32>
      tpu.vector_store %arg9[%c0_39, %c0_40], %57 {strides = array<i32>} : memref<8x1xf32, #tpu.memory_space<vmem>>, vector<8x1xf32>,
    } else {
    }
    %c0 = arith.constant 0 : index
    %c0_1 = arith.constant 0 : index
    %3 = vector.load %arg2[%c0, %c0_1] : memref<8x128xf32, #tpu.memory_space<vmem>>, vector<8x128xf32>
    %c0_2 = arith.constant 0 : index
    %c0_3 = arith.constant 0 : index
    %4 = vector.load %arg4[%c0_2, %c0_3] : memref<8x128xf32, #tpu.memory_space<vmem>>, vector<1x128xf32>
    %c1 = arith.constant 1 : index
    %c0_4 = arith.constant 0 : index
    %5 = vector.load %arg4[%c1, %c0_4] : memref<8x128xf32, #tpu.memory_space<vmem>>, vector<1x128xf32>
    %c0_5 = arith.constant 0 : index
    %c0_6 = arith.constant 0 : index
    %6 = vector.load %arg5[%c0_5, %c0_6] : memref<8x128xf32, #tpu.memory_space<vmem>>, vector<8x1xf32>
    %7 = arith.mulf %3, %3 : vector<8x128xf32>
    %cst = arith.constant 2.000000e-06 : f32
    %8 = vector.broadcast %cst : f32 to vector<8x128xf32>
    %9 = arith.mulf %8, %3 : vector<8x128xf32>
    %10 = arith.addf %7, %9 : vector<8x128xf32>
    %cst_7 = arith.constant dense<0.000000e+00> : vector<8xf32>
    %11 = vector.multi_reduction <add>, %10, %cst_7 [1] : vector<8x128xf32> to vector<8xf32>
    %12 = vector.shape_cast %11 : vector<8xf32> to vector<8x1xf32>
    %c0_8 = arith.constant 0 : index
    %c0_9 = arith.constant 0 : index
    %13 = vector.load %arg3[%c0_8, %c0_9] : memref<128x128xf32, #tpu.memory_space<vmem>>, vector<128x128xf32>
    %cst_10 = arith.constant dense<0.000000e+00> : vector<8x128xf32>
    %14 = tpu.matmul %3, %13, %cst_10 {dimension_numbers = #tpu.dot_dimension_numbers<[1], [0], [0], [1], [0, 0, 1, 1], [], []>} : vector<8x128xf32>, vector<128x128xf32>, vector<8x128xf32> -> vector<8x128xf32>
    %15 = vector.broadcast %12 : vector<8x1xf32> to vector<8x128xf32>
    %16 = arith.addf %14, %15 : vector<8x128xf32>
    %17 = vector.broadcast %4 : vector<1x128xf32> to vector<8x128xf32>
    %18 = arith.addf %16, %17 : vector<8x128xf32>
    %cst_11 = arith.constant 0.000000e+00 : f32
    %19 = vector.broadcast %cst_11 : f32 to vector<8x128xf32>
    %20 = arith.maximumf %18, %19 : vector<8x128xf32>
    %21 = math.sqrt %20 : vector<8x128xf32>
    %cst_12 = arith.constant -1.000000e-01 : f32
    %22 = vector.broadcast %cst_12 : f32 to vector<8x128xf32>
    %23 = arith.mulf %22, %21 : vector<8x128xf32>
    %24 = math.exp %23 : vector<8x128xf32>
    %25 = vector.broadcast %6 : vector<8x1xf32> to vector<8x128xf32>
    %26 = vector.broadcast %5 : vector<1x128xf32> to vector<8x128xf32>
    %27 = arith.cmpf oeq, %25, %26 : vector<8x128xf32>
    %28 = arith.extui %27 : vector<8x128xi1> to vector<8x128xi32>
    %29 = arith.sitofp %28 : vector<8x128xi32> to vector<8x128xf32>
    %c0_13 = arith.constant 0 : index
    %c0_14 = arith.constant 0 : index
    %30 = vector.load %arg7[%c0_13, %c0_14] : memref<8x1xf32, #tpu.memory_space<vmem>>, vector<8x1xf32>
    %cst_15 = arith.constant dense<0.000000e+00> : vector<8xf32>
    %31 = vector.multi_reduction <add>, %24, %cst_15 [1] : vector<8x128xf32> to vector<8xf32>
    %32 = vector.shape_cast %31 : vector<8xf32> to vector<8x1xf32>
    %33 = arith.addf %30, %32 : vector<8x1xf32>
    %c0_16 = arith.constant 0 : index
    %c0_17 = arith.constant 0 : index
    %34 = vector.load %arg7[%c0_16, %c0_17] : memref<8x1xf32, #tpu.memory_space<vmem>>, vector<8x1xf32>
    tpu.vector_store %arg7[%c0_16, %c0_17], %33 {strides = array<i32>} : memref<8x1xf32, #tpu.memory_space<vmem>>, vector<8x1xf32>,
    %c0_18 = arith.constant 0 : index
    %c0_19 = arith.constant 0 : index
    %35 = vector.load %arg8[%c0_18, %c0_19] : memref<8x1xf32, #tpu.memory_space<vmem>>, vector<8x1xf32>
    %36 = arith.mulf %24, %29 : vector<8x128xf32>
    %cst_20 = arith.constant dense<0.000000e+00> : vector<8xf32>
    %37 = vector.multi_reduction <add>, %36, %cst_20 [1] : vector<8x128xf32> to vector<8xf32>
    %38 = vector.shape_cast %37 : vector<8xf32> to vector<8x1xf32>
    %39 = arith.addf %35, %38 : vector<8x1xf32>
    %c0_21 = arith.constant 0 : index
    %c0_22 = arith.constant 0 : index
    %40 = vector.load %arg8[%c0_21, %c0_22] : memref<8x1xf32, #tpu.memory_space<vmem>>, vector<8x1xf32>
    tpu.vector_store %arg8[%c0_21, %c0_22], %39 {strides = array<i32>} : memref<8x1xf32, #tpu.memory_space<vmem>>, vector<8x1xf32>,
    %c0_23 = arith.constant 0 : index
    %c0_24 = arith.constant 0 : index
    %41 = vector.load %arg9[%c0_23, %c0_24] : memref<8x1xf32, #tpu.memory_space<vmem>>, vector<8x1xf32>
    %cst_25 = arith.constant 0.000000e+00 : f32
    %42 = vector.broadcast %cst_25 : f32 to vector<8x128xf32>
    %43 = arith.cmpf ogt, %29, %42 : vector<8x128xf32>
    %cst_26 = arith.constant 3.400000e+38 : f32
    %44 = vector.broadcast %cst_26 : f32 to vector<8x128xf32>
    %45 = arith.select %43, %21, %44 : vector<8x128xi1>, vector<8x128xf32>
    %cst_27 = arith.constant dense<0x7F800000> : vector<8xf32>
    %46 = vector.multi_reduction <minimumf>, %45, %cst_27 [1] : vector<8x128xf32> to vector<8xf32>
    %47 = vector.shape_cast %46 : vector<8xf32> to vector<8x1xf32>
    %48 = arith.minimumf %41, %47 : vector<8x1xf32>
    %c0_28 = arith.constant 0 : index
    %c0_29 = arith.constant 0 : index
    %49 = vector.load %arg9[%c0_28, %c0_29] : memref<8x1xf32, #tpu.memory_space<vmem>>, vector<8x1xf32>
    tpu.vector_store %arg9[%c0_28, %c0_29], %48 {strides = array<i32>} : memref<8x1xf32, #tpu.memory_space<vmem>>, vector<8x1xf32>,
    %c0_i32_30 = arith.constant 0 : i32
    %50 = arith.cmpi eq, %arg1, %c0_i32_30 : i32
    %51 = arith.extui %50 : i1 to i32
    %c0_i32_31 = arith.constant 0 : i32
    %52 = arith.cmpi ne, %51, %c0_i32_31 : i32
    scf.if %52 {
      %c0_32 = arith.constant 0 : index
      %c0_33 = arith.constant 0 : index
      %53 = vector.load %arg7[%c0_32, %c0_33] : memref<8x1xf32, #tpu.memory_space<vmem>>, vector<8x1xf32>
      %c0_34 = arith.constant 0 : index
      %c0_35 = arith.constant 0 : index
      %54 = vector.load %arg8[%c0_34, %c0_35] : memref<8x1xf32, #tpu.memory_space<vmem>>, vector<8x1xf32>
      %cst_36 = arith.constant 0.000000e+00 : f32
      %55 = vector.broadcast %cst_36 : f32 to vector<8x1xf32>
      %56 = arith.cmpf ogt, %53, %55 : vector<8x1xf32>
      %cst_37 = arith.constant 1.000000e-30 : f32
      %57 = vector.broadcast %cst_37 : f32 to vector<8x1xf32>
      %58 = arith.maximumf %53, %57 : vector<8x1xf32>
      %59 = arith.divf %54, %58 : vector<8x1xf32>
      %cst_38 = arith.constant 9.99999997E-7 : f32
      %60 = vector.broadcast %cst_38 : f32 to vector<8x1xf32>
      %61 = arith.addf %54, %60 : vector<8x1xf32>
      %62 = arith.select %56, %59, %61 : vector<8x1xi1>, vector<8x1xf32>
      %63 = math.log %62 : vector<8x1xf32>
      %cst_39 = arith.constant 0.000000e+00 : f32
      %64 = vector.broadcast %cst_39 : f32 to vector<8x1xf32>
      %65 = arith.subf %64, %63 : vector<8x1xf32>
      %66 = tpu.iota {dimensions = array<i32: 1>} : vector<8x128xi32>
      %c0_i32_40 = arith.constant 0 : i32
      %67 = vector.broadcast %c0_i32_40 : i32 to vector<8x128xi32>
      %68 = arith.cmpi eq, %66, %67 : vector<8x128xi32>
      %c1_i32 = arith.constant 1 : i32
      %69 = vector.broadcast %c1_i32 : i32 to vector<8x128xi32>
      %70 = arith.cmpi eq, %66, %69 : vector<8x128xi32>
      %c2_i32 = arith.constant 2 : i32
      %71 = vector.broadcast %c2_i32 : i32 to vector<8x128xi32>
      %72 = arith.cmpi eq, %66, %71 : vector<8x128xi32>
      %c0_41 = arith.constant 0 : index
      %c0_42 = arith.constant 0 : index
      %73 = vector.load %arg9[%c0_41, %c0_42] : memref<8x1xf32, #tpu.memory_space<vmem>>, vector<8x1xf32>
      %cst_43 = arith.constant 0.000000e+00 : f32
      %74 = vector.shape_cast %73 : vector<8x1xf32> to vector<8x1xf32>
      %75 = vector.broadcast %74 : vector<8x1xf32> to vector<8x128xf32>
      %76 = vector.broadcast %cst_43 : f32 to vector<8x128xf32>
      %77 = arith.select %72, %75, %76 : vector<8x128xi1>, vector<8x128xf32>
      %78 = vector.shape_cast %62 : vector<8x1xf32> to vector<8x1xf32>
      %79 = vector.broadcast %78 : vector<8x1xf32> to vector<8x128xf32>
      %80 = arith.select %70, %79, %77 : vector<8x128xi1>, vector<8x128xf32>
      %81 = vector.shape_cast %65 : vector<8x1xf32> to vector<8x1xf32>
      %82 = vector.broadcast %81 : vector<8x1xf32> to vector<8x128xf32>
      %83 = arith.select %68, %82, %80 : vector<8x128xi1>, vector<8x128xf32>
      %c0_44 = arith.constant 0 : index
      %c0_45 = arith.constant 0 : index
      %84 = vector.load %arg6[%c0_44, %c0_45] : memref<8x128xf32, #tpu.memory_space<vmem>>, vector<8x128xf32>
      tpu.vector_store %arg6[%c0_44, %c0_45], %83 {strides = array<i32>} : memref<8x128xf32, #tpu.memory_space<vmem>>, vector<8x128xf32>,
    } else {
    }
    return
  }
  func.func @transform_0(%arg0: i32, %arg1: i32) -> (i32, i32) {
    %c0_i32 = arith.constant 0 : i32
    %c0_i32_0 = arith.constant 0 : i32
    return %arg0, %c0_i32 : i32, i32
  }
  func.func @transform_1(%arg0: i32, %arg1: i32) -> (i32, i32) {
    %c0_i32 = arith.constant 0 : i32
    %c0_i32_0 = arith.constant 0 : i32
    return %c0_i32, %arg1 : i32, i32
  }
  func.func @transform_2(%arg0: i32, %arg1: i32) -> (i32, i32) {
    %c0_i32 = arith.constant 0 : i32
    %c0_i32_0 = arith.constant 0 : i32
    return %c0_i32, %arg1 : i32, i32
  }
  func.func @transform_3(%arg0: i32, %arg1: i32) -> (i32, i32) {
    %c0_i32 = arith.constant 0 : i32
    %c0_i32_0 = arith.constant 0 : i32
    return %arg0, %c0_i32 : i32, i32
  }
  func.func @transform_4(%arg0: i32, %arg1: i32) -> (i32, i32) {
    %c0_i32 = arith.constant 0 : i32
    %c0_i32_0 = arith.constant 0 : i32
    return %arg0, %c0_i32 : i32, i32
  }
}

</mosaic_0001>

<bundles_post_ra>
// kernel: tpu_custom_call.1
= control target key start
LH: loop header
LB: loop body
LE: loop exit
PB: predicated region body
PF: predicated region fallthrough
CT: control target
= control target key end

     0   :  { %9 = vsyncpa [#allocation6], 0  ;;  %s534_s0 = inlined_call_operand.hbm [shape: f32[8,128], index: 0, kind: input, shape index: {}]   ;;  %s535_s1 = inlined_call_operand.hbm [shape: f32[128,128], index: 1, kind: input, shape index: {}]   ;;  %s536_s2 = inlined_call_operand.hbm [shape: f32[8,128], index: 2, kind: input, shape index: {}]   ;;  %s537_s3 = inlined_call_operand.hbm [shape: f32[8,128], index: 3, kind: input, shape index: {}]   ;;  %s538_s4 = inlined_call_operand.hbm [shape: f32[8,128], index: 4, kind: output, shape index: {}]  }
   0x1   :  { %10 = vsyncpa [#allocation9], 0 }
   0x2   :  { %11 = vsyncpa [#allocation12], 0 }
   0x3   :  { %12 = vsyncpa [#allocation7], 0  ;;  %s457_s15 = smov [#allocation8]  }
   0x4   :  { %s28_s16 = sshll.u32 %s457_s15, 4  ;;  %s29_s16 = int_to_ptr.vmem [resolvable:$true] %s28_s16 }
   0x5   :  { %s357_s17 = scalar_lea.vmem %s29_s16, 2048  ;;  %p362_p1 = scmp.lt.s32.totalorder %s29_s16, %s29_s16 }
   0x6   :  { %p358_p0 = scmp.ne.s32.totalorder %s29_s16, %s357_s17  ;;  %p363_p2 = scmp.lt.s32.totalorder %s357_s17, %s357_s17 }
   0x8   :  { %p364_p3 = por %p363_p2, %p362_p1 }
   0xa   :  { %p365_p4 = pnand %p364_p3, %p358_p0 }
   0xc   :  { %368 = shalt.err (!%p365_p4)
}
   0xd   :  { %s458_s18 = smov 128   ;;  %s459_s19 = smov 8  }
   0xe   :  { %34 = dma.hbm_to_vmem [thread:$0]  %s535_s1, 2048, %s29_s16, [#allocation9], %s458_s18, %s458_s18, %s459_s19  }
   0xf   :  { %s460_s22 = smov [#allocation5]   ;;  %s461_s24 = smov [#allocation10]  }
  0x10   :  { %s19_s23 = sshll.u32 %s460_s22, 4  ;;  %s41_s25 = sshll.u32 %s461_s24, 4  ;;  %s20_s23 = int_to_ptr.vmem [resolvable:$true] %s19_s23  ;;  %s42_s25 = int_to_ptr.vmem [resolvable:$true] %s41_s25 }
  0x11   :  { %s377_s26 = scalar_lea.vmem %s20_s23, 128  ;;  %p382_p6 = scmp.lt.s32.totalorder %s20_s23, %s20_s23 }
  0x12   :  { %p378_p5 = scmp.ne.s32.totalorder %s20_s23, %s377_s26  ;;  %p383_p7 = scmp.lt.s32.totalorder %s377_s26, %s377_s26 }
  0x14   :  { %p384_p8 = por %p383_p7, %p382_p6 }
  0x16   :  { %p385_p9 = pnand %p384_p8, %p378_p5 }
  0x18   :  { %388 = shalt.err (!%p385_p9)
}
  0x19   :  { %22 = dma.hbm_to_vmem [thread:$0]  %s534_s0, 128, %s20_s23, [#allocation6]  }
  0x1a   :  { %s397_s29 = scalar_lea.vmem %s42_s25, 128  ;;  %p402_p11 = scmp.lt.s32.totalorder %s42_s25, %s42_s25 }
  0x1b   :  { %p398_p10 = scmp.ne.s32.totalorder %s42_s25, %s397_s29  ;;  %p403_p12 = scmp.lt.s32.totalorder %s397_s29, %s397_s29 }
  0x1d   :  { %p404_p13 = por %p403_p12, %p402_p11 }
  0x1f   :  { %p405_p0 = pnand %p404_p13, %p398_p10 }
  0x21   :  { %408 = shalt.err (!%p405_p0)
}
  0x22   :  { %44 = dma.hbm_to_vmem [thread:$0]  %s536_s2, 128, %s42_s25, [#allocation9]  }
  0x23   :  { %s462_s5 = smov [#allocation11]  }
  0x24   :  { %s51_s6 = sshll.u32 %s462_s5, 4  ;;  %s52_s6 = int_to_ptr.vmem [resolvable:$true] %s51_s6 }
  0x25   :  { %s417_s7 = scalar_lea.vmem %s52_s6, 128  ;;  %p422_p2 = scmp.lt.s32.totalorder %s52_s6, %s52_s6 }
  0x26   :  { %p418_p1 = scmp.ne.s32.totalorder %s52_s6, %s417_s7  ;;  %p423_p3 = scmp.lt.s32.totalorder %s417_s7, %s417_s7 }
  0x28   :  { %p424_p4 = por %p423_p3, %p422_p2 }
  0x2a   :  { %p425_p5 = pnand %p424_p4, %p418_p1 }
  0x2c   :  { %428 = shalt.err (!%p425_p5)
}
  0x2d   :  { %54 = dma.hbm_to_vmem [thread:$0]  %s537_s3, 128, %s52_s6, [#allocation12]  }
  0x2e   :  { %449 = dma.done.wait [#allocation6], 128  }
  0x2f   :  { %450 = vsyncadd [#allocation6], 4294967168 }
  0x30   :  { %451 = dma.done.wait [#allocation9], 2176  }
  0x31   :  { %452 = vsyncadd [#allocation9], 4294965120 }
  0x32   :  { %453 = dma.done.wait [#allocation12], 128  }
  0x33   :  { %454 = vsyncadd [#allocation12], 4294967168  ;;  %v463_v0 = vmov 0.0   ;;  %vm464_vm0 = vmmov 0   ;;  %v465_v1 = vmov 0   ;;  %v99_v2 = vld [vmem:[#allocation8 + $0x78] sm:$0xff] }
  0x34   :  { %293 = vmatprep.subr.mxu0 %v463_v0  ;;  %325 = vmatprep.mubr.msk.f32.mxu0 %vm464_vm0, %v463_v0  ;;  %v98_v3 = vld [vmem:[#allocation8 + $0x70] sm:$0xff]  ;;  %v97_v4 = vld [vmem:[#allocation8 + $0x68] sm:$0xff]  ;;  %v96_v5 = vld [vmem:[#allocation8 + $0x60] sm:$0xff]  ;;  %vm71_vm1 = vcmask 7168   ;;  %v466_v43 = vmov 3.4e+38  }
  0x35   :  { %339 = vset.pattern.permute.xlu0 %v465_v1  ;;  %340 = vset.pattern.permute.xlu1 %v465_v1  ;;  %v75_v6 = vld [vmem:[#allocation5] sm:$0xff]  ;;  %v94_v10 = vld [vmem:[#allocation8 + $0x50] sm:$0xff]  ;;  %v93_v12 = vld [vmem:[#allocation8 + $0x48] sm:$0xff]  ;;  %72 = vst.msk [vmem:[#allocation2] sm:$0xff] %vm71_vm1, %v463_v0  ;;  %s467_s2 = smov [#allocation13]  }
  0x36   :  { %294 = vmatpush3.msra.mxu0 %v99_v2  ;;  %v95_v7 = vld [vmem:[#allocation8 + $0x58] sm:$0xff]  ;;  %v79_v8 = vmul.f32 %v75_v6, %v75_v6  ;;  %v80_v9 = vmul.f32 2e-06, %v75_v6  ;;  %v92_v13 = vld [vmem:[#allocation8 + $0x40] sm:$0xff]  ;;  %v90_v15 = vld [vmem:[#allocation8 + $0x30] sm:$0xff]  ;;  %73 = vst.msk [vmem:[#allocation3] sm:$0xff] %vm71_vm1, %v463_v0 }
  0x37   :  { %295 = vmatprep.subr.mxu0 %v463_v0  ;;  %v91_v14 = vld [vmem:[#allocation8 + $0x38] sm:$0xff]  ;;  %v89_v16 = vld [vmem:[#allocation8 + $0x28] sm:$0xff]  ;;  %v88_v17 = vld [vmem:[#allocation8 + $0x20] sm:$0xff]  ;;  %74 = vst.msk [vmem:[#allocation4] sm:$0xff] %vm71_vm1, %v466_v43  ;;  %s262_s3 = sshll.u32 %s467_s2, 4  ;;  %s263_s3 = int_to_ptr.vmem [resolvable:$true] %s262_s3 }
  0x38   :  { %296 = vmatpush3.msra.mxu0 %v98_v3  ;;  %v81_v11 = vadd.f32 %v80_v9, %v79_v8  ;;  %v87_v18 = vld [vmem:[#allocation8 + $0x18] sm:$0xff]  ;;  %v86_v19 = vld [vmem:[#allocation8 + $0x10] sm:$0xff]  ;;  %v85_v20 = vld [vmem:[#allocation8 + $0x8] sm:$0xff]  ;;  %s429_s9 = scalar_lea.vmem %s263_s3, 128  ;;  %p434_p7 = scmp.lt.s32.totalorder %s263_s3, %s263_s3 }
  0x39   :  { %297 = vmatprep.subr.mxu0 %v463_v0  ;;  %v84_v21 = vld [vmem:[#allocation8] sm:$0xff]  ;;  %v78_v22 = vld [vmem:[#allocation11] sm:$0xff]  ;;  %p430_p6 = scmp.ne.s32.totalorder %s263_s3, %s429_s9  ;;  %p435_p8 = scmp.lt.s32.totalorder %s429_s9, %s429_s9 }
  0x3a   :  { %298 = vmatpush3.msra.mxu0 %v97_v4  ;;  %82 = vadd.xlane.f32.xlu0 %v81_v11  ;;  %v273_v25 = vld [vmem:[#allocation10] ss:$0 sm:$0xff]  ;;  %v274_v37 = vld [vmem:[#allocation10 + $0x1] ss:$0 sm:$0xff] }
  0x3b   :  { %299 = vmatprep.subr.mxu0 %v463_v0  ;;  %p436_p9 = por %p435_p8, %p434_p7 }
  0x3c   :  { %300 = vmatpush3.msra.mxu0 %v96_v5  ;;  %v198_v44 = vld [vmem:[#allocation2] sm:$0xff] }
  0x3d   :  { %301 = vmatprep.subr.mxu0 %v463_v0  ;;  %v204_v47 = vld [vmem:[#allocation3] sm:$0xff]  ;;  %p437_p10 = pnand %p436_p9, %p430_p6 }
  0x3e   :  { %302 = vmatpush3.msra.mxu0 %v95_v7  ;;  %v210_v50 = vld [vmem:[#allocation4] sm:$0xff] }
  0x3f   :  { %303 = vmatprep.subr.mxu0 %v463_v0 }
  0x40   :  { %304 = vmatpush3.msra.mxu0 %v94_v10 }
  0x41   :  { %305 = vmatprep.subr.mxu0 %v463_v0 }
  0x42   :  { %306 = vmatpush3.msra.mxu0 %v93_v12 }
  0x43   :  { %307 = vmatprep.subr.mxu0 %v463_v0 }
  0x44   :  { %308 = vmatpush3.msra.mxu0 %v92_v13 }
  0x45   :  { %309 = vmatprep.subr.mxu0 %v463_v0 }
  0x46   :  { %310 = vmatpush3.msra.mxu0 %v91_v14 }
  0x47   :  { %311 = vmatprep.subr.mxu0 %v463_v0 }
  0x48   :  { %312 = vmatpush3.msra.mxu0 %v90_v15 }
  0x49   :  { %313 = vmatprep.subr.mxu0 %v463_v0 }
  0x4a   :  { %314 = vmatpush3.msra.mxu0 %v89_v16 }
  0x4b   :  { %315 = vmatprep.subr.mxu0 %v463_v0 }
  0x4c   :  { %316 = vmatpush3.msra.mxu0 %v88_v17 }
  0x4d   :  { %317 = vmatprep.subr.mxu0 %v463_v0 }
  0x4e   :  { %318 = vmatpush3.msra.mxu0 %v87_v18 }
  0x4f   :  { %319 = vmatprep.subr.mxu0 %v463_v0 }
  0x50   :  { %320 = vmatpush3.msra.mxu0 %v86_v19  ;;  %188 = vperm.xlu0 %339, %v78_v22  }
  0x51   :  { %321 = vmatprep.subr.mxu0 %v463_v0 }
  0x52   :  { %322 = vmatpush3.msra.mxu0 %v85_v20 }
  0x53   :  { %323 = vmatprep.subr.mxu0 %v463_v0 }
  0x54   :  { %324 = vmatpush3.msra.mxu0 %v84_v21 }
  0x55   :  { %326 = vmatmul.mubr.f32.vlgmr.msra.gmra.mxu0 %v75_v6 }
  0xc3   :  { %v83_v23 = vpop.xlane.xlu0 %82 }
  0xcb   :  { %v189_v38 = vpop.permute.xlu0 %188 }
  0xcc   :  { %vm195_vm4 = vcmp.eq.f32.partialorder %v189_v38, %v274_v37 }
  0xcd   :  { %v275_v40 = vsel %vm195_vm4, 1.0, %v463_v0  ;;  %v231_v0 = vlaneseq }
  0xce   :  { %vm211_vm5 = vcmp.gt.f32.partialorder %v275_v40, 0.0 }
  0xcf   :  { %v232_v1 = vand.u32 127, %v231_v0 }
  0xd1   :  { %vm235_vm7 = vcmp.eq.s32.totalorder %v232_v1, 2  ;;  %vm234_vm8 = vcmp.eq.s32.totalorder %v232_v1, 1  ;;  %vm233_vm9 = vcmp.eq.s32.totalorder %v232_v1, 0 }
 0x115   :  { %v166_v24 = vpop.f32.mrf.mxu0 }
 0x116   :  { %v167_v26 = vadd.f32 %v166_v24, %v83_v23 }
 0x117   :  { %v327_v27 = vpop.f32.mrf.mxu0 }
 0x118   :  { %v174_v28 = vadd.f32 %v273_v25, %v167_v26 }
 0x11a   :  { %v175_v29 = vmax.f32 %v174_v28, 0.0 }
 0x11c   :  { %341 = vrsqrt.f32 %v175_v29  ;;  %vm178_vm2 = vcmp.eq.f32.partialorder %v175_v29, inf  ;;  %v181_v32 = vand.u32 2147483648, %v175_v29  ;;  %vm180_vm3 = vcmp.eq.f32.partialorder %v175_v29, 0.0 }
 0x129   :  { %v342_v30 = vpop.eup %341 }
 0x12a   :  { %v177_v31 = vmul.f32 %v342_v30, %v175_v29 }
 0x12c   :  { %v179_v33 = vsel %vm178_vm2, %v175_v29, %v177_v31 }
 0x12d   :  { %v182_v34 = vsel %vm180_vm3, %v181_v32, %v179_v33 }
 0x12e   :  { %v183_v35 = vmul.f32 -0.1, %v182_v34  ;;  %v212_v42 = vsel %vm211_vm5, %v182_v34, 3.4e+38 }
 0x130   :  { %v184_v36 = vmul.f32 1.442695, %v183_v35 }
 0x132   :  { %343 = vpow2.f32 %v184_v36 }
 0x13f   :  { %v344_v39 = vpop.eup %343 }
 0x140   :  { %199 = vadd.xlane.f32.xlu1 %v344_v39  ;;  %v205_v41 = vmul.f32 %v344_v39, %v275_v40 }
 0x144   :  { %206 = vadd.xlane.f32.xlu1 %v205_v41 }
 0x148   :  { %213 = vmin.xlane.f32.xlu1 %v212_v42 }
 0x1c9   :  { %v200_v45 = vpop.xlane.xlu1 %199 }
 0x1ca   :  { %v201_v46 = vadd.f32 %v200_v45, %v198_v44 }
 0x1cc   :  { %203 = vst.msk [vmem:[#allocation2] sm:$0xff] %vm71_vm1, %v201_v46 }
 0x1cd   :  { %v207_v48 = vpop.xlane.xlu1 %206 }
 0x1ce   :  { %v208_v49 = vadd.f32 %v207_v48, %v204_v47 }
 0x1d0   :  { %209 = vst.msk [vmem:[#allocation3] sm:$0xff] %vm71_vm1, %v208_v49 }
 0x1d1   :  { %v214_v51 = vpop.xlane.xlu1 %213 }
 0x1d2   :  { %v215_v52 = vmin.f32 %v210_v50, %v214_v51 }
 0x1d3   :  { %v220_v53 = vld [vmem:[#allocation2] sm:$0xff] }
 0x1d4   :  { %216 = vst.msk [vmem:[#allocation4] sm:$0xff] %vm71_vm1, %v215_v52  ;;  %v223_v54 = vmax.f32 %v220_v53, 1e-30  ;;  %vm222_vm6 = vcmp.gt.f32.partialorder %v220_v53, 0.0 }
 0x1d6   :  { %345 = vrcp.f32 %v223_v54 }
 0x1d7   :  { %v221_v56 = vld [vmem:[#allocation3] sm:$0xff] }
 0x1d8   :  { %v226_v59 = vadd.f32 1e-06, %v221_v56 }
 0x1db   :  { %v236_v55 = vld [vmem:[#allocation4] sm:$0xff] }
 0x1dc   :  { %239 = vperm.xlu1 %340, %v236_v55  }
 0x1e3   :  { %v346_v57 = vpop.eup %345 }
 0x1e4   :  { %v225_v58 = vmul.f32 %v346_v57, %v221_v56 }
 0x1e6   :  { %v227_v60 = vsel %vm222_vm6, %v225_v58, %v226_v59 }
 0x1e7   :  { %245 = vperm.xlu1 %340, %v227_v60   ;;  %347 = vlog2.f32 %v227_v60 }
 0x1f4   :  { %v348_v61 = vpop.eup %347 }
 0x1f5   :  { %v229_v62 = vmul.f32 0.6931472, %v348_v61 }
 0x1f7   :  { %v230_v63 = vsub.f32 0.0, %v229_v62 }
 0x1f9   :  { %251 = vperm.xlu1 %340, %v230_v63  }
 0x257   :  { %v240_v2 = vpop.permute.xlu1 %239 }
 0x258   :  { %v242_v4 = vsel %vm235_vm7, %v240_v2, 0.0 }
 0x262   :  { %v246_v3 = vpop.permute.xlu1 %245 }
 0x263   :  { %v248_v5 = vsel %vm234_vm8, %v246_v3, %v242_v4 }
 0x274   :  { %v252_v6 = vpop.permute.xlu1 %251 }
 0x275   :  { %v254_v7 = vsel %vm233_vm9, %v252_v6, %v248_v5 }
 0x276   :  { %255 = vst [vmem:[#allocation13] sm:$0xff] %v254_v7 }
 0x277   :  { %440 = shalt.err (!%p437_p10)
}
 0x278   :  { %265 = dma.vmem_to_hbm [thread:$0]  %s263_s3, 128, %s538_s4, [#allocation7]  }
 0x279   :  { %455 = dma.done.wait [#allocation7], 128  }
 0x27a   :  { %456 = vsyncadd [#allocation7], 4294967168 }
 0x27b   :  { %269 = vsyncpa [#allocation6], 1 }
 0x27c   :  { %270 = vsyncpa [#allocation9], 1 }
 0x27d   :  { %271 = vsyncpa [#allocation12], 1 }
 0x27e   :  { %272 = vsyncpa [#allocation7], 1 }

</bundles_post_ra>
